<compile_context>
chip_gen: v7x
topology: tpu7x:2x2x1
jax: 0.10.0
libtpu: 0.0.40
codegen_flags: <defaults>
</compile_context>

<pallas_src>
import functools

import jax
import jax.numpy as jnp
from jax import lax
from jax.experimental import pallas as pl
from jax.experimental.pallas import tpu as pltpu


# -----------------------------------------------------------------------------
# Budget / tiling helpers
# -----------------------------------------------------------------------------
def _budget():
    """Returns (block_bytes_fp32_equiv, vmem_limit_bytes, want_multi_parallel)."""
    vmem = None
    try:
        vmem = getattr(pltpu.get_tpu_info(), "vmem_capacity_bytes", None)
    except Exception:
        vmem = None
    if vmem is None or vmem <= 80 * 1024 * 1024:
        # v7x-class (64 MiB VMEM per TC) or unknown: conservative blocks, 2 TCs to feed.
        return 4 * 1024 * 1024, 48 * 1024 * 1024, True
    # v5e / v6e: 128 MiB physical VMEM -> bigger blocks amortize ~0.35 us/grid-step.
    return 6 * 1024 * 1024, 64 * 1024 * 1024, False


def _sublane_align(dtype):
    # 8 sublanes of 32 bit; sub-32-bit dtypes pack along sublanes (16 bf16, 32 int8).
    return max(8, 32 // jnp.dtype(dtype).itemsize)


def _pick_tile(full, align, cap):
    """Largest divisor of `full` that is a multiple of `align` and <= cap.

    Falls back to `full` itself (a block dim equal to the array dim is always legal
    w.r.t. the (8, 128) block rule).
    """
    cap = max(align, min(full, cap))
    best = 0
    d = align
    while d <= cap:
        if full % d == 0:
            best = d
        d += align
    return best if best else full


def _params_to_nc1(p, N, C):
    # (1|N, C, 1, 1) -> (N, C, 1)
    return jnp.broadcast_to(p, (N, C, 1, 1)).reshape(N, C, 1)


# -----------------------------------------------------------------------------
# Kernels
# -----------------------------------------------------------------------------
def _bn_train_fused_kernel(x_ref, g_ref, b_ref, out_ref, stats_ref, *, eps, inv_count):
    """Single-pass reduce + apply when the whole (N, tc, L) slab fits the budget.

    x_ref     : (N, tc, L)  channels on sublanes, spatial on lanes
    g_ref     : (N, tc, 1)  per-(sample, channel) gain
    b_ref     : (N, tc, 1)  per-(sample, channel) bias
    out_ref   : (N, tc, L)
    stats_ref : (2, tc, 1)  fp32: row 0 = batch mean, row 1 = batch (biased) var
    """
    xf = x_ref[...].astype(jnp.float32)                                           # (N, tc, L)
    s1 = jnp.sum(jnp.sum(xf, axis=2, keepdims=True), axis=0, keepdims=True)       # (1, tc, 1)
    s2 = jnp.sum(jnp.sum(xf * xf, axis=2, keepdims=True), axis=0, keepdims=True)  # (1, tc, 1)
    m = s1 * inv_count
    var = jnp.maximum(s2 * inv_count - m * m, 0.0)       # clamp cancellation error

    # manual_bn casts the float stats back to x's dtype before fused_bn.
    m_c = m.astype(x_ref.dtype).astype(jnp.float32)
    v_c = var.astype(x_ref.dtype).astype(jnp.float32)

    scale = lax.rsqrt(v_c + eps)                                                   # (1, tc, 1)
    gain = g_ref[...].astype(jnp.float32)
    bias = b_ref[...].astype(jnp.float32)
    scale_g = scale * gain                                                         # (N, tc, 1)
    shift = m_c * scale_g - bias

    out_ref[...] = (xf * scale_g - shift).astype(out_ref.dtype)
    stats_ref[0:1, :, :] = m_c
    stats_ref[1:2, :, :] = v_c


def _bn_train_phased_kernel(x_ref, g_ref, b_ref, out_ref, stats_ref, sum_ref,
                            *, eps, inv_count):
    """Two-phase pipeline, grid (C//tc, 2, L//tl); phase 0 reduce, phase 1 apply.

    sum_ref : (2, tc, 1) fp32 VMEM scratch — row 0 = Σx, row 1 = Σx² for this c-tile.
    """
    p = pl.program_id(1)
    l = pl.program_id(2)

    @pl.when((p == 0) & (l == 0))
    def _():
        sum_ref[...] = jnp.zeros_like(sum_ref)

    @pl.when(p == 0)
    def _():
        xf = x_ref[...].astype(jnp.float32)                                            # (N, tc, tl)
        s1 = jnp.sum(jnp.sum(xf, axis=2, keepdims=True), axis=0, keepdims=True)        # (1, tc, 1)
        s2 = jnp.sum(jnp.sum(xf * xf, axis=2, keepdims=True), axis=0, keepdims=True)
        sum_ref[0:1, :, :] += s1
        sum_ref[1:2, :, :] += s2

    @pl.when((p == 1) & (l == 0))
    def _():
        m = sum_ref[0:1, :, :] * inv_count
        var = jnp.maximum(sum_ref[1:2, :, :] * inv_count - m * m, 0.0)
        stats_ref[0:1, :, :] = m.astype(x_ref.dtype).astype(jnp.float32)
        stats_ref[1:2, :, :] = var.astype(x_ref.dtype).astype(jnp.float32)

    @pl.when(p == 1)
    def _():
        m = sum_ref[0:1, :, :] * inv_count
        var = jnp.maximum(sum_ref[1:2, :, :] * inv_count - m * m, 0.0)
        m_c = m.astype(x_ref.dtype).astype(jnp.float32)
        v_c = var.astype(x_ref.dtype).astype(jnp.float32)
        scale = lax.rsqrt(v_c + eps)
        gain = g_ref[...].astype(jnp.float32)
        bias = b_ref[...].astype(jnp.float32)
        scale_g = scale * gain                                                     # (N, tc, 1)
        shift = m_c * scale_g - bias
        out_ref[...] = (x_ref[...].astype(jnp.float32) * scale_g - shift).astype(out_ref.dtype)


def _bn_eval_kernel(x_ref, scale_ref, shift_ref, out_ref):
    """fused_bn with precomputed per-(sample, channel) scale/shift: pure stream."""
    x = x_ref[...].astype(jnp.float32)                                             # (tn, tc, tl)
    out_ref[...] = (x * scale_ref[...] - shift_ref[...]).astype(out_ref.dtype)


# -----------------------------------------------------------------------------
# Wrappers (native NCHW -> (N, C, H*W): reshape only, no data movement)
# -----------------------------------------------------------------------------
def my_bn_train(x, gain, bias, stored_mean, stored_var, counter,
                *, eps=1e-5, momentum=0.1, accumulate_standing=False,
                block_bytes=None):
    """Training-mode myBN.forward.  Returns (out, new_mean, new_var, new_counter)."""
    N, C, H, W = x.shape
    L = H * W
    x_k = x.reshape(N, C, L)
    g_k = _params_to_nc1(gain, N, C)
    b_k = _params_to_nc1(bias, N, C)

    blk, vmem_limit, want_multi = _budget()
    if block_bytes is not None:
        blk = block_bytes
    budget_elems = max(1, blk // 4)          # fp32-equivalent budgeting
    c_align = _sublane_align(x.dtype)
    itemsize = jnp.dtype(x.dtype).itemsize
    inv_count = 1.0 / float(N * L)

    # Lane tile: keep the whole spatial extent if the budget allows; else go phased.
    # TODO(synk): when L < 128 (late-generator 4x4/8x8 maps) the lane dim is
    # partially masked; a channel-last layout (C on lanes) would be denser there.
    cap_tl = max(min(L, 128), budget_elems // max(1, N * c_align))
    tl = _pick_tile(L, 128, cap_tl)

    def _pick_tc(tl_):
        cap_tc = max(c_align, budget_elems // max(1, N * tl_))
        if want_multi and C >= 2 * c_align:
            cap_tc = min(cap_tc, C // 2)     # >= 2 parallel grid steps for 2 TCs
        return _pick_tile(C, c_align, cap_tc)

    if tl >= L:
        # Single fused pass: 1 read + 1 write of x.
        tc = _pick_tc(L)
        kernel = functools.partial(_bn_train_fused_kernel, eps=eps, inv_count=inv_count)
        cost = pl.CostEstimate(flops=int(7 * N * C * L),
                               transcendentals=int(C),
                               bytes_accessed=int(2 * N * C * L * itemsize))
        out_k, stats = pl.pallas_call(
            kernel,
            grid_spec=pltpu.PrefetchScalarGridSpec(
                num_scalar_prefetch=0,
                grid=(C // tc,),
                in_specs=[
                    pl.BlockSpec((N, tc, L), lambda c: (0, c, 0)),
                    pl.BlockSpec((N, tc, 1), lambda c: (0, c, 0)),
                    pl.BlockSpec((N, tc, 1), lambda c: (0, c, 0)),
                ],
                out_specs=[
                    pl.BlockSpec((N, tc, L), lambda c: (0, c, 0)),
                    pl.BlockSpec((2, tc, 1), lambda c: (0, c, 0)),
                ],
            ),
            out_shape=(
                jax.ShapeDtypeStruct((N, C, L), x.dtype),
                jax.ShapeDtypeStruct((2, C, 1), jnp.float32),
            ),
            compiler_params=pltpu.CompilerParams(
                dimension_semantics=("parallel",),
                vmem_limit_bytes=vmem_limit,
            ),
            cost_estimate=cost,
        )(x_k, g_k, b_k)
    else:
        # Two-phase pipeline: phase 0 reduce over L tiles, phase 1 apply (2 reads + 1 write).
        tc = _pick_tc(tl)
        n_l = L // tl
        kernel = functools.partial(_bn_train_phased_kernel, eps=eps, inv_count=inv_count)
        cost = pl.CostEstimate(flops=int(9 * N * C * L),
                               transcendentals=int(C),
                               bytes_accessed=int(3 * N * C * L * itemsize))
        out_k, stats = pl.pallas_call(
            kernel,
            grid_spec=pltpu.PrefetchScalarGridSpec(
                num_scalar_prefetch=0,
                grid=(C // tc, 2, n_l),
                in_specs=[
                    pl.BlockSpec((N, tc, tl), lambda c, p, l: (0, c, l)),
                    pl.BlockSpec((N, tc, 1), lambda c, p, l: (0, c, 0)),
                    pl.BlockSpec((N, tc, 1), lambda c, p, l: (0, c, 0)),
                ],
                out_specs=[
                    # Phase 0 parks on output block l=0 (never written there);
                    # phase 1 writes each l block exactly once -> no redundant writebacks.
                    pl.BlockSpec((N, tc, tl), lambda c, p, l: (0, c, l * p)),
                    pl.BlockSpec((2, tc, 1), lambda c, p, l: (0, c, 0)),
                ],
                scratch_shapes=[pltpu.VMEM((2, tc, 1), jnp.float32)],
            ),
            out_shape=(
                jax.ShapeDtypeStruct((N, C, L), x.dtype),
                jax.ShapeDtypeStruct((2, C, 1), jnp.float32),
            ),
            compiler_params=pltpu.CompilerParams(
                dimension_semantics=("parallel", "arbitrary", "arbitrary"),
                vmem_limit_bytes=vmem_limit,
            ),
            cost_estimate=cost,
        )(x_k, g_k, b_k)

    out = out_k.reshape(N, C, H, W)
    mean = stats[0, :, 0]
    var = stats[1, :, 0]

    if accumulate_standing:
        new_mean = stored_mean + mean
        new_var = stored_var + var
        new_counter = counter + 1.0
    else:
        new_mean = stored_mean * (1.0 - momentum) + mean * momentum
        new_var = stored_var * (1.0 - momentum) + var * momentum
        new_counter = counter
    return out, new_mean, new_var, new_counter


def my_bn_eval(x, gain, bias, stored_mean, stored_var, counter,
               *, eps=1e-5, accumulate_standing=False, block_bytes=None):
    """Eval-mode myBN.forward using stored statistics (fused_bn)."""
    N, C, H, W = x.shape
    L = H * W
    x_k = x.reshape(N, C, L)

    mean = stored_mean.astype(jnp.float32)
    var = stored_var.astype(jnp.float32)
    if accumulate_standing:
        denom = jnp.where(counter[0] > 0, counter[0], 1.0)   # guard counter == 0
        mean = mean / denom
        var = var / denom

    # Precompute per-(sample, channel) scale/shift in fp32 (tiny arrays).
    mean4 = mean.reshape(1, C, 1, 1)
    var4 = var.reshape(1, C, 1, 1)
    gain4 = jnp.broadcast_to(gain, (N, C, 1, 1)).astype(jnp.float32)
    bias4 = jnp.broadcast_to(bias, (N, C, 1, 1)).astype(jnp.float32)
    scale4 = lax.rsqrt(var4 + eps) * gain4
    shift4 = mean4 * scale4 - bias4
    scale_k = scale4.reshape(N, C, 1)
    shift_k = shift4.reshape(N, C, 1)

    blk, vmem_limit, _ = _budget()
    if block_bytes is not None:
        blk = block_bytes
    budget_elems = max(1, blk // 4)
    c_align = _sublane_align(x.dtype)
    itemsize = jnp.dtype(x.dtype).itemsize

    # Lane tile first (dense stores), then channels, then batch.
    tl = _pick_tile(L, 128, max(min(L, 128), budget_elems // c_align))
    tc = _pick_tile(C, c_align, max(c_align, budget_elems // tl))
    tn = _pick_tile(N, 1, max(1, budget_elems // (tc * tl)))

    cost = pl.CostEstimate(flops=int(2 * N * C * L),
                           transcendentals=0,
                           bytes_accessed=int(2 * N * C * L * itemsize))

    out_k = pl.pallas_call(
        _bn_eval_kernel,
        grid_spec=pltpu.PrefetchScalarGridSpec(
            num_scalar_prefetch=0,
            grid=(N // tn, C // tc, L // tl),
            in_specs=[
                pl.BlockSpec((tn, tc, tl), lambda n, c, l: (n, c, l)),
                pl.BlockSpec((tn, tc, 1), lambda n, c, l: (n, c, 0)),
                pl.BlockSpec((tn, tc, 1), lambda n, c, l: (n, c, 0)),
            ],
            out_specs=pl.BlockSpec((tn, tc, tl), lambda n, c, l: (n, c, l)),
        ),
        out_shape=jax.ShapeDtypeStruct((N, C, L), x.dtype),
        compiler_params=pltpu.CompilerParams(
            dimension_semantics=("parallel", "parallel", "parallel"),
            vmem_limit_bytes=vmem_limit,
        ),
        cost_estimate=cost,
    )(x_k, scale_k, shift_k)

    return out_k.reshape(N, C, H, W)


# -----------------------------------------------------------------------------
# Pure-JAX reference (mirrors manual_bn / fused_bn) for correctness checking
# -----------------------------------------------------------------------------
def _ref_manual_bn(x, gain, bias, eps):
    xf = x.astype(jnp.float32)
    m = jnp.mean(xf, axis=(0, 2, 3), keepdims=True)
    m2 = jnp.mean(xf * xf, axis=(0, 2, 3), keepdims=True)
    var = (m2 - m * m).astype(x.dtype)
    m = m.astype(x.dtype)
    scale = lax.rsqrt(var + eps) * gain
    shift = m * scale - bias
    out = x * scale - shift
    return out, jnp.squeeze(m), jnp.squeeze(var)


if __name__ == "__main__":
    key = jax.random.PRNGKey(0)
    kx, kg, kb = jax.random.split(key, 3)

    N, C, H, W = 2, 4, 16, 16
    eps, momentum = 1e-5, 0.1

    x = jax.random.normal(kx, (N, C, H, W), dtype=jnp.float32)
    # gain/bias as produced by BigGAN-style conditional BN: (N, C, 1, 1)
    gain = 1.0 + 0.1 * jax.random.normal(kg, (N, C, 1, 1), dtype=jnp.float32)
    bias = 0.1 * jax.random.normal(kb, (N, C, 1, 1), dtype=jnp.float32)

    # module buffers (deterministic init, matching myBN.__init__)
    stored_mean = jnp.zeros((C,), dtype=jnp.float32)
    stored_var = jnp.ones((C,), dtype=jnp.float32)
    counter = jnp.zeros((1,), dtype=jnp.float32)

    out_ref, m_ref, v_ref = _ref_manual_bn(x, gain, bias, eps)

    # --- training-mode forward, fused single-pass path ---
    out, new_mean, new_var, new_counter = my_bn_train(
        x, gain, bias, stored_mean, stored_var, counter,
        eps=eps, momentum=momentum, accumulate_standing=False)
    jax.block_until_ready(out)
    assert jnp.allclose(out, out_ref, atol=1e-5, rtol=1e-5)
    assert jnp.allclose(new_mean, stored_mean * 0.9 + m_ref * 0.1, atol=1e-6)
    assert jnp.allclose(new_var, stored_var * 0.9 + v_ref * 0.1, atol=1e-6)

    # --- training-mode forward, phased reduce-then-apply path (forced with a tiny
    #     block budget so both code paths are exercised at the small test shapes) ---
    out_p, new_mean_p, new_var_p, _ = my_bn_train(
        x, gain, bias, stored_mean, stored_var, counter,
        eps=eps, momentum=momentum, accumulate_standing=False,
        block_bytes=8 * 1024)
    jax.block_until_ready(out_p)
    assert jnp.allclose(out_p, out_ref, atol=1e-5, rtol=1e-5)
    assert jnp.allclose(new_mean_p, new_mean, atol=1e-6)
    assert jnp.allclose(new_var_p, new_var, atol=1e-6)

    # --- eval-mode forward with the updated running stats ---
    out_eval = my_bn_eval(x, gain, bias, new_mean, new_var, new_counter, eps=eps)
    jax.block_until_ready(out_eval)
    scale_e = lax.rsqrt(new_var.reshape(1, C, 1, 1) + eps) * gain
    shift_e = new_mean.reshape(1, C, 1, 1) * scale_e - bias
    assert jnp.allclose(out_eval, x * scale_e - shift_e, atol=1e-5, rtol=1e-5)

    print("KERNEL_OK")
</pallas_src>

<mosaic_0001>
module attributes {stable_mosaic.version = 11 : i64} {
  func.func @_bn_train_fused_kernel(%arg0: i32, %arg1: memref<2x4x256xf32, #tpu.memory_space<vmem>>, %arg2: memref<2x4x1xf32, #tpu.memory_space<vmem>>, %arg3: memref<2x4x1xf32, #tpu.memory_space<vmem>>, %arg4: memref<2x4x256xf32, #tpu.memory_space<vmem>>, %arg5: memref<2x4x1xf32, #tpu.memory_space<vmem>>) attributes {dimension_semantics = [#tpu.dimension_semantics<parallel>], iteration_bounds = array<i64: 1>, scalar_prefetch = 0 : i64, scratch_operands = 0 : i64, tpu.core_type = #tpu.core_type<tc>, window_params = [{transform_indices = @transform_0, window_bounds = array<i64: 2, 4, 256>}, {transform_indices = @transform_1, window_bounds = array<i64: 2, 4, 1>}, {transform_indices = @transform_2, window_bounds = array<i64: 2, 4, 1>}, {transform_indices = @transform_3, window_bounds = array<i64: 2, 4, 256>}, {transform_indices = @transform_4, window_bounds = array<i64: 2, 4, 1>}]} {
    %c0 = arith.constant 0 : index
    %c0_0 = arith.constant 0 : index
    %c0_1 = arith.constant 0 : index
    %0 = vector.load %arg1[%c0, %c0_0, %c0_1] : memref<2x4x256xf32, #tpu.memory_space<vmem>>, vector<2x4x256xf32>
    %cst = arith.constant dense<0.000000e+00> : vector<2x4xf32>
    %1 = vector.multi_reduction <add>, %0, %cst [2] : vector<2x4x256xf32> to vector<2x4xf32>
    %2 = vector.shape_cast %1 : vector<2x4xf32> to vector<2x4x1xf32>
    %cst_2 = arith.constant dense<0.000000e+00> : vector<4x1xf32>
    %3 = vector.multi_reduction <add>, %2, %cst_2 [0] : vector<2x4x1xf32> to vector<4x1xf32>
    %4 = vector.shape_cast %3 : vector<4x1xf32> to vector<1x4x1xf32>
    %5 = arith.mulf %0, %0 : vector<2x4x256xf32>
    %cst_3 = arith.constant dense<0.000000e+00> : vector<2x4xf32>
    %6 = vector.multi_reduction <add>, %5, %cst_3 [2] : vector<2x4x256xf32> to vector<2x4xf32>
    %7 = vector.shape_cast %6 : vector<2x4xf32> to vector<2x4x1xf32>
    %cst_4 = arith.constant dense<0.000000e+00> : vector<4x1xf32>
    %8 = vector.multi_reduction <add>, %7, %cst_4 [0] : vector<2x4x1xf32> to vector<4x1xf32>
    %9 = vector.shape_cast %8 : vector<4x1xf32> to vector<1x4x1xf32>
    %cst_5 = arith.constant 0.001953125 : f32
    %10 = vector.broadcast %cst_5 : f32 to vector<1x4x1xf32>
    %11 = arith.mulf %4, %10 : vector<1x4x1xf32>
    %cst_6 = arith.constant 0.001953125 : f32
    %12 = vector.broadcast %cst_6 : f32 to vector<1x4x1xf32>
    %13 = arith.mulf %9, %12 : vector<1x4x1xf32>
    %14 = arith.mulf %11, %11 : vector<1x4x1xf32>
    %15 = arith.subf %13, %14 : vector<1x4x1xf32>
    %cst_7 = arith.constant 0.000000e+00 : f32
    %16 = vector.broadcast %cst_7 : f32 to vector<1x4x1xf32>
    %17 = arith.maximumf %15, %16 : vector<1x4x1xf32>
    %cst_8 = arith.constant 9.99999974E-6 : f32
    %18 = vector.broadcast %cst_8 : f32 to vector<1x4x1xf32>
    %19 = arith.addf %17, %18 : vector<1x4x1xf32>
    %20 = math.rsqrt %19 : vector<1x4x1xf32>
    %c0_9 = arith.constant 0 : index
    %c0_10 = arith.constant 0 : index
    %c0_11 = arith.constant 0 : index
    %21 = vector.load %arg2[%c0_9, %c0_10, %c0_11] : memref<2x4x1xf32, #tpu.memory_space<vmem>>, vector<2x4x1xf32>
    %c0_12 = arith.constant 0 : index
    %c0_13 = arith.constant 0 : index
    %c0_14 = arith.constant 0 : index
    %22 = vector.load %arg3[%c0_12, %c0_13, %c0_14] : memref<2x4x1xf32, #tpu.memory_space<vmem>>, vector<2x4x1xf32>
    %23 = vector.broadcast %20 : vector<1x4x1xf32> to vector<2x4x1xf32>
    %24 = arith.mulf %23, %21 : vector<2x4x1xf32>
    %25 = vector.broadcast %11 : vector<1x4x1xf32> to vector<2x4x1xf32>
    %26 = arith.mulf %25, %24 : vector<2x4x1xf32>
    %27 = arith.subf %26, %22 : vector<2x4x1xf32>
    %28 = vector.broadcast %24 : vector<2x4x1xf32> to vector<2x4x256xf32>
    %29 = arith.mulf %0, %28 : vector<2x4x256xf32>
    %30 = vector.broadcast %27 : vector<2x4x1xf32> to vector<2x4x256xf32>
    %31 = arith.subf %29, %30 : vector<2x4x256xf32>
    %c0_15 = arith.constant 0 : index
    %c0_16 = arith.constant 0 : index
    %c0_17 = arith.constant 0 : index
    %32 = vector.load %arg4[%c0_15, %c0_16, %c0_17] : memref<2x4x256xf32, #tpu.memory_space<vmem>>, vector<2x4x256xf32>
    tpu.vector_store %arg4[%c0_15, %c0_16, %c0_17], %31 {strides = array<i32>} : memref<2x4x256xf32, #tpu.memory_space<vmem>>, vector<2x4x256xf32>,
    %c0_18 = arith.constant 0 : index
    %c0_19 = arith.constant 0 : index
    %c0_20 = arith.constant 0 : index
    %33 = vector.load %arg5[%c0_18, %c0_19, %c0_20] : memref<2x4x1xf32, #tpu.memory_space<vmem>>, vector<1x4x1xf32>
    tpu.vector_store %arg5[%c0_18, %c0_19, %c0_20], %11 {strides = array<i32>} : memref<2x4x1xf32, #tpu.memory_space<vmem>>, vector<1x4x1xf32>,
    %c1 = arith.constant 1 : index
    %c0_21 = arith.constant 0 : index
    %c0_22 = arith.constant 0 : index
    %34 = vector.load %arg5[%c1, %c0_21, %c0_22] : memref<2x4x1xf32, #tpu.memory_space<vmem>>, vector<1x4x1xf32>
    tpu.vector_store %arg5[%c1, %c0_21, %c0_22], %17 {strides = array<i32>} : memref<2x4x1xf32, #tpu.memory_space<vmem>>, vector<1x4x1xf32>,
    return
  }
  func.func @transform_0(%arg0: i32) -> (i32, i32, i32) {
    %c0_i32 = arith.constant 0 : i32
    %c0_i32_0 = arith.constant 0 : i32
    %c0_i32_1 = arith.constant 0 : i32
    return %c0_i32, %arg0, %c0_i32_0 : i32, i32, i32
  }
  func.func @transform_1(%arg0: i32) -> (i32, i32, i32) {
    %c0_i32 = arith.constant 0 : i32
    %c0_i32_0 = arith.constant 0 : i32
    %c0_i32_1 = arith.constant 0 : i32
    return %c0_i32, %arg0, %c0_i32_0 : i32, i32, i32
  }
  func.func @transform_2(%arg0: i32) -> (i32, i32, i32) {
    %c0_i32 = arith.constant 0 : i32
    %c0_i32_0 = arith.constant 0 : i32
    %c0_i32_1 = arith.constant 0 : i32
    return %c0_i32, %arg0, %c0_i32_0 : i32, i32, i32
  }
  func.func @transform_3(%arg0: i32) -> (i32, i32, i32) {
    %c0_i32 = arith.constant 0 : i32
    %c0_i32_0 = arith.constant 0 : i32
    %c0_i32_1 = arith.constant 0 : i32
    return %c0_i32, %arg0, %c0_i32_0 : i32, i32, i32
  }
  func.func @transform_4(%arg0: i32) -> (i32, i32, i32) {
    %c0_i32 = arith.constant 0 : i32
    %c0_i32_0 = arith.constant 0 : i32
    %c0_i32_1 = arith.constant 0 : i32
    return %c0_i32, %arg0, %c0_i32_0 : i32, i32, i32
  }
}

</mosaic_0001>

<bundles_post_ra>
// kernel: tpu_custom_call.1
= control target key start
LH: loop header
LB: loop body
LE: loop exit
PB: predicated region body
PF: predicated region fallthrough
CT: control target
= control target key end

     0   :  { %vm25_vm0 = vcmask 1043456   ;;  %s285_s0 = inlined_call_operand.vmem [shape: f32[2,4,256], index: 0, kind: input, shape index: {}]   ;;  %s286_s1 = inlined_call_operand.vmem [shape: f32[2,4,1], index: 1, kind: input, shape index: {}]   ;;  %s287_s2 = inlined_call_operand.vmem [shape: f32[2,4,1], index: 2, kind: input, shape index: {}]   ;;  %s288_s3 = inlined_call_operand.hbm [shape: f32[2,4,256], index: 3, kind: output, shape index: {0}]   ;;  %s289_s4 = inlined_call_operand.vmem [shape: f32[2,4,1], index: 4, kind: output, shape index: {1}]  }
   0x1   :  { %v224_v0 = vld [vmem:[%s285_s0] sm:$0xff]  ;;  %v229_v1 = vld [vmem:[%s285_s0 + $0x8] sm:$0xff] }
   0x2   :  { %10 = vsyncpa [#allocation3], 0  ;;  %v21_v2 = vcombine.high %v224_v0, %v224_v0  ;;  %v26_v3 = vsel %vm25_vm0, %v224_v0, 0.0  ;;  %v39_v4 = vmul.f32 %v224_v0, %v224_v0  ;;  %v22_v5 = vcombine.high %v229_v1, %v229_v1  ;;  %v68_v37 = vld [vmem:[%s286_s1 + $0x4] sm:$0xf] }
   0x3   :  { %v31_v6 = vsel %vm25_vm0, %v229_v1, 0.0  ;;  %v40_v7 = vmul.f32 %v229_v1, %v229_v1  ;;  %v191_v20 = vmov 0   ;;  %vm131_vm1 = vcmask 3072   ;;  %v67_v38 = vld [vmem:[%s286_s1] sm:$0xf]  ;;  %s193_s1 = smov [#allocation2]  }
   0x4   :  { %v27_v8 = vsel %vm25_vm0, %v21_v2, 0.0  ;;  %v43_v9 = vcombine.high %v39_v4, %v39_v4  ;;  %v47_v10 = vsel %vm25_vm0, %v39_v4, 0.0  ;;  %v32_v11 = vsel %vm25_vm0, %v22_v5, 0.0  ;;  %162 = vset.pattern.permute.xlu1 %v191_v20  ;;  %161 = vset.pattern.permute.xlu0 %v191_v20  ;;  %v69_v42 = vld [vmem:[%s287_s2] sm:$0xf] }
   0x5   :  { %v28_v12 = vadd.f32 %v27_v8, %v26_v3  ;;  %v44_v13 = vcombine.high %v40_v7, %v40_v7  ;;  %v52_v15 = vsel %vm25_vm0, %v40_v7, 0.0  ;;  %v33_v17 = vadd.f32 %v32_v11, %v31_v6  ;;  %v70_v46 = vld [vmem:[%s287_s2 + $0x4] sm:$0xf]  ;;  %s140_s2 = sshll.u32 %s193_s1, 4  ;;  %s141_s2 = int_to_ptr.vmem [resolvable:$true] %s140_s2 }
   0x6   :  { %v48_v14 = vsel %vm25_vm0, %v43_v9, 0.0  ;;  %v192_v48 = vmov 839922192   ;;  %v88_v50 = vlaneseq  ;;  %s167_s29 = scalar_lea.vmem %s141_s2, 256  ;;  %p172_p1 = scmp.lt.s32.totalorder %s141_s2, %s141_s2 }
   0x7   :  { %29 = vadd.xlane.f32.xlu0 %v28_v12  ;;  %v49_v16 = vadd.f32 %v48_v14, %v47_v10  ;;  %v53_v18 = vsel %vm25_vm0, %v44_v13, 0.0  ;;  %v86_v49 = vunpack.c.l.s4 %v192_v48  ;;  %p168_p0 = scmp.ne.s32.totalorder %s141_s2, %s167_s29  ;;  %p173_p2 = scmp.lt.s32.totalorder %s167_s29, %s167_s29 }
   0x8   :  { %v54_v19 = vadd.f32 %v53_v18, %v52_v15  ;;  %v89_v52 = vshrl.u32 %v88_v50, 7 }
   0x9   :  { %50 = vadd.xlane.f32.xlu1 %v49_v16  ;;  %v87_v51 = vunpack.c.0.s8 %v86_v49  ;;  %p174_p3 = por %p173_p2, %p172_p1 }
   0xb   :  { %34 = vadd.xlane.f32.xlu0 %v33_v17  ;;  %v90_v53 = vsub.s32 %v87_v51, %v89_v52  ;;  %p175_p4 = pnand %p174_p3, %p168_p0 }
   0xd   :  { %55 = vadd.xlane.f32.xlu1 %v54_v19 }
  0x94   :  { %v30_v21 = vpop.xlane.xlu0 %29 }
  0x95   :  { %v36_v24 = vsel %vm25_vm0, %v30_v21, 0.0 }
  0x96   :  { %v51_v22 = vpop.xlane.xlu1 %50 }
  0x97   :  { %v57_v28 = vsel %vm25_vm0, %v51_v22, 0.0 }
  0x98   :  { %v35_v23 = vpop.xlane.xlu0 %34 }
  0x99   :  { %v37_v25 = vsel %vm25_vm0, %v35_v23, 0.0 }
  0x9a   :  { %v38_v26 = vadd.f32 %v37_v25, %v36_v24  ;;  %v56_v27 = vpop.xlane.xlu1 %55 }
  0x9b   :  { %v58_v29 = vsel %vm25_vm0, %v56_v27, 0.0 }
  0x9c   :  { %v60_v30 = vmul.f32 0.001953125, %v38_v26  ;;  %v59_v31 = vadd.f32 %v58_v29, %v57_v28 }
  0x9e   :  { %v61_v32 = vmul.f32 0.001953125, %v59_v31  ;;  %v62_v33 = vmul.f32 %v60_v30, %v60_v30  ;;  %132 = vst.msk [vmem:[%s289_s4] sm:$0xf] %vm131_vm1, %v60_v30 }
  0xa0   :  { %v63_v34 = vsub.f32 %v61_v32, %v62_v33 }
  0xa2   :  { %v64_v35 = vmax.f32 %v63_v34, 0.0 }
  0xa4   :  { %v65_v36 = vadd.f32 1e-05, %v64_v35  ;;  %155 = vst.msk [vmem:[%s289_s4 + $0x4] sm:$0xf] %vm131_vm1, %v64_v35 }
  0xa6   :  { %165 = vrsqrt.f32 %v65_v36 }
  0xb0   :  { %v166_v39 = vpop.eup %165 }
  0xb1   :  { %v72_v40 = vmul.f32 %v166_v39, %v68_v37  ;;  %v71_v41 = vmul.f32 %v166_v39, %v67_v38 }
  0xb3   :  { %83 = vperm.xlu1 %162, %v72_v40   ;;  %79 = vperm.xlu0 %161, %v71_v41   ;;  %v73_v43 = vmul.f32 %v71_v41, %v60_v30  ;;  %v74_v45 = vmul.f32 %v72_v40, %v60_v30 }
  0xb5   :  { %v75_v44 = vsub.f32 %v73_v43, %v69_v42  ;;  %v76_v47 = vsub.f32 %v74_v45, %v70_v46 }
  0xb7   :  { %105 = vperm.xlu1 %162, %v75_v44  }
  0xbb   :  { %109 = vperm.xlu1 %162, %v76_v47  }
 0x132   :  { %v84_v54 = vpop.permute.xlu1 %83  ;;  %v80_v55 = vpop.permute.xlu0 %79 }
 0x133   :  { %v91_v56 = vrot.slane %v80_v55, %v90_v53  ;;  %v98_v58 = vrot.slane %v84_v54, %v90_v53 }
 0x135   :  { %v101_v59 = vmul.f32 %v91_v56, %v224_v0  ;;  %v102_v63 = vmul.f32 %v98_v58, %v229_v1 }
 0x136   :  { %v106_v57 = vpop.permute.xlu1 %105 }
 0x137   :  { %v117_v60 = vrot.slane %v106_v57, %v90_v53 }
 0x139   :  { %v127_v61 = vsub.f32 %v101_v59, %v117_v60 }
 0x13a   :  { %v110_v62 = vpop.permute.xlu1 %109 }
 0x13b   :  { %129 = vst [vmem:[#allocation2] sm:$0xff] %v127_v61  ;;  %v124_v2 = vrot.slane %v110_v62, %v90_v53 }
 0x13d   :  { %v128_v3 = vsub.f32 %v102_v63, %v124_v2 }
 0x13f   :  { %130 = vst [vmem:[#allocation2 + $0x8] sm:$0xff] %v128_v3 }
 0x140   :  { %178 = shalt.err (!%p175_p4)
}
 0x141   :  { %s179_s6 = scalar_lea.hbm %s288_s3, 256 }
 0x142   :  { %p180_p5 = scmp.ne.s32.totalorder %s288_s3, %s179_s6  ;;  %p183_p6 = scmp.lt.u32.totalorder %s179_s6, %s288_s3 }
 0x144   :  { %p185_p7 = pnand %p183_p6, %p180_p5 }
 0x146   :  { %188 = shalt.err (!%p185_p7)
}
 0x147   :  { %s194_s11 = smov 128   ;;  %s195_s12 = smov 8  }
 0x148   :  { %146 = dma.vmem_to_hbm [thread:$0]  %s141_s2, 256, %s288_s3, [#allocation3], %s194_s11, %s194_s11, %s195_s12  }
 0x149   :  { %189 = dma.done.wait [#allocation3], 256  }
 0x14a   :  { %190 = vsyncadd [#allocation3], 4294967040 }
 0x14b   :  { %154 = vsyncpa [#allocation3], 1 }

</bundles_post_ra>
